<compile_context>
chip_gen: v6e
topology: v6e:2x2x1
jax: 0.10.0
libtpu: 0.0.40
codegen_flags: <defaults>
</compile_context>

<pallas_src>
import jax
import jax.numpy as jnp
from jax.experimental import pallas as pl
from jax.experimental.pallas import tpu as pltpu

IN_FEATURES = 7
LANES = 128


def _lr_kernel(x_ref, w_ref, b_ref, o_ref):
    """One batch tile of y = sigmoid(x @ W^T + b).

    x_ref: (F, BR, 128) f32 VMEM   feature-major, lane-dense input tile
    w_ref: (F,)         f32 SMEM   linear weights
    b_ref: (1,)         f32 SMEM   bias
    o_ref: (BR, 128)    f32 VMEM   lane-dense output tile
    """
    num_features = x_ref.shape[0]
    # Contraction over the 7 features as scalar-broadcast FMAs on the VPU
    # (a K=7 / N_out=1 matmul would waste an entire MXU tile).
    z = x_ref[0] * w_ref[0]
    for f in range(1, num_features):          # static unroll (7 iterations)
        z = z + x_ref[f] * w_ref[f]
    z = z + b_ref[0]
    # exp goes to the EUP; saturates cleanly to 0/1 for large |z| in f32.
    o_ref[...] = jax.nn.sigmoid(z)


def lr_forward(x, weight, bias, *, block_rows=512):
    """sigmoid(x @ weight.T + bias); x: (N, F), weight: (1, F), bias: (1,)."""
    N, F = x.shape
    w_flat = weight.reshape(-1).astype(jnp.float32)
    b_flat = bias.reshape(-1).astype(jnp.float32)
    assert w_flat.shape == (F,)
    assert b_flat.shape == (1,)
    x = x.astype(jnp.float32)

    # Batch is viewed as `rows` groups of 128 samples (128 -> lanes).
    rows = pl.cdiv(N, LANES)
    # Tile rows in multiples of 8 (sublane alignment); ~block_rows*128 samples
    # per grid step (~2 MiB input block at the default) to amortize per-step
    # grid overhead while staying far under VMEM limits on v5e/v6e/v7x.
    br = min(block_rows, pl.cdiv(rows, 8) * 8)
    rows_pad = pl.cdiv(rows, br) * br
    n_pad = rows_pad * LANES

    if n_pad != N:
        x = jnp.pad(x, ((0, n_pad - N), (0, 0)))

    # Feature-major, lane-dense layout: x_fm[f, r, l] == x[r*128 + l, f].
    # (Skip this transpose if the upstream layout is already feature-major.)
    x_fm = x.T.reshape(F, rows_pad, LANES)

    grid = (rows_pad // br,)
    out = pl.pallas_call(
        _lr_kernel,
        out_shape=jax.ShapeDtypeStruct((rows_pad, LANES), jnp.float32),
        grid_spec=pl.GridSpec(
            grid=grid,
            in_specs=[
                # x tile: all 7 features, one block of `br` 128-sample rows.
                pl.BlockSpec((F, br, LANES), lambda i: (0, i, 0)),
                # weights / bias as SMEM scalars (no per-step VMEM DMA).
                pl.BlockSpec(memory_space=pltpu.MemorySpace.SMEM),
                pl.BlockSpec(memory_space=pltpu.MemorySpace.SMEM),
            ],
            out_specs=pl.BlockSpec((br, LANES), lambda i: (i, 0)),
        ),
        compiler_params=pltpu.CompilerParams(
            dimension_semantics=("parallel",),
        ),
    )(x_fm, w_flat, b_flat)

    # (rows_pad, 128) -> (n_pad, 1) is a free row-major reshape; drop padding.
    return out.reshape(n_pad, 1)[:N]


if __name__ == "__main__":
    key = jax.random.PRNGKey(0)
    kx, kw, kb, kx2 = jax.random.split(key, 4)

    N, F = 8, IN_FEATURES
    x = jax.random.normal(kx, (N, F), dtype=jnp.float32)

    # Deterministic params (mimics nn.Linear uniform(-1/sqrt(F), 1/sqrt(F))).
    bound = 1.0 / jnp.sqrt(jnp.float32(F))
    weight = jax.random.uniform(kw, (1, F), minval=-bound, maxval=bound,
                                dtype=jnp.float32)
    bias = jax.random.uniform(kb, (1,), minval=-bound, maxval=bound,
                              dtype=jnp.float32)

    out = jax.block_until_ready(lr_forward(x, weight, bias))
    ref = jax.nn.sigmoid(x @ weight.T + bias)
    assert out.shape == (N, 1)
    assert jnp.allclose(out, ref, atol=1e-5, rtol=1e-5)

    # Second check: batch not a multiple of the tile -> exercises zero-padding
    # and a multi-step parallel grid.
    N2 = 2500
    x2 = jax.random.normal(kx2, (N2, F), dtype=jnp.float32)
    out2 = jax.block_until_ready(lr_forward(x2, weight, bias, block_rows=8))
    ref2 = jax.nn.sigmoid(x2 @ weight.T + bias)
    assert out2.shape == (N2, 1)
    assert jnp.allclose(out2, ref2, atol=1e-5, rtol=1e-5)

    print("KERNEL_OK")
</pallas_src>

<mosaic_0001>
module attributes {stable_mosaic.version = 11 : i64} {
  func.func @_lr_kernel(%arg0: i32, %arg1: memref<7x8x128xf32, #tpu.memory_space<vmem>>, %arg2: memref<7xf32, #tpu.memory_space<smem>>, %arg3: memref<1xf32, #tpu.memory_space<smem>>, %arg4: memref<8x128xf32, #tpu.memory_space<vmem>>) attributes {dimension_semantics = [#tpu.dimension_semantics<parallel>], iteration_bounds = array<i64: 1>, scalar_prefetch = 0 : i64, scratch_operands = 0 : i64, tpu.core_type = #tpu.core_type<tc>, window_params = [{transform_indices = @transform_0, window_bounds = array<i64: 7, 8, 128>}, {transform_indices = @transform_1, window_bounds = array<i64: 7>}, {transform_indices = @transform_2, window_bounds = array<i64: 1>}, {transform_indices = @transform_3, window_bounds = array<i64: 8, 128>}]} {
    %c0 = arith.constant 0 : index
    %c0_0 = arith.constant 0 : index
    %c0_1 = arith.constant 0 : index
    %0 = vector.load %arg1[%c0, %c0_0, %c0_1] : memref<7x8x128xf32, #tpu.memory_space<vmem>>, vector<1x8x128xf32>
    %1 = vector.shape_cast %0 : vector<1x8x128xf32> to vector<8x128xf32>
    %c0_2 = arith.constant 0 : index
    %2 = memref.load %arg2[%c0_2] : memref<7xf32, #tpu.memory_space<smem>>
    %3 = vector.broadcast %2 : f32 to vector<8x128xf32>
    %4 = arith.mulf %1, %3 : vector<8x128xf32>
    %c1 = arith.constant 1 : index
    %c0_3 = arith.constant 0 : index
    %c0_4 = arith.constant 0 : index
    %5 = vector.load %arg1[%c1, %c0_3, %c0_4] : memref<7x8x128xf32, #tpu.memory_space<vmem>>, vector<1x8x128xf32>
    %6 = vector.shape_cast %5 : vector<1x8x128xf32> to vector<8x128xf32>
    %c1_5 = arith.constant 1 : index
    %7 = memref.load %arg2[%c1_5] : memref<7xf32, #tpu.memory_space<smem>>
    %8 = vector.broadcast %7 : f32 to vector<8x128xf32>
    %9 = arith.mulf %6, %8 : vector<8x128xf32>
    %10 = arith.addf %4, %9 : vector<8x128xf32>
    %c2 = arith.constant 2 : index
    %c0_6 = arith.constant 0 : index
    %c0_7 = arith.constant 0 : index
    %11 = vector.load %arg1[%c2, %c0_6, %c0_7] : memref<7x8x128xf32, #tpu.memory_space<vmem>>, vector<1x8x128xf32>
    %12 = vector.shape_cast %11 : vector<1x8x128xf32> to vector<8x128xf32>
    %c2_8 = arith.constant 2 : index
    %13 = memref.load %arg2[%c2_8] : memref<7xf32, #tpu.memory_space<smem>>
    %14 = vector.broadcast %13 : f32 to vector<8x128xf32>
    %15 = arith.mulf %12, %14 : vector<8x128xf32>
    %16 = arith.addf %10, %15 : vector<8x128xf32>
    %c3 = arith.constant 3 : index
    %c0_9 = arith.constant 0 : index
    %c0_10 = arith.constant 0 : index
    %17 = vector.load %arg1[%c3, %c0_9, %c0_10] : memref<7x8x128xf32, #tpu.memory_space<vmem>>, vector<1x8x128xf32>
    %18 = vector.shape_cast %17 : vector<1x8x128xf32> to vector<8x128xf32>
    %c3_11 = arith.constant 3 : index
    %19 = memref.load %arg2[%c3_11] : memref<7xf32, #tpu.memory_space<smem>>
    %20 = vector.broadcast %19 : f32 to vector<8x128xf32>
    %21 = arith.mulf %18, %20 : vector<8x128xf32>
    %22 = arith.addf %16, %21 : vector<8x128xf32>
    %c4 = arith.constant 4 : index
    %c0_12 = arith.constant 0 : index
    %c0_13 = arith.constant 0 : index
    %23 = vector.load %arg1[%c4, %c0_12, %c0_13] : memref<7x8x128xf32, #tpu.memory_space<vmem>>, vector<1x8x128xf32>
    %24 = vector.shape_cast %23 : vector<1x8x128xf32> to vector<8x128xf32>
    %c4_14 = arith.constant 4 : index
    %25 = memref.load %arg2[%c4_14] : memref<7xf32, #tpu.memory_space<smem>>
    %26 = vector.broadcast %25 : f32 to vector<8x128xf32>
    %27 = arith.mulf %24, %26 : vector<8x128xf32>
    %28 = arith.addf %22, %27 : vector<8x128xf32>
    %c5 = arith.constant 5 : index
    %c0_15 = arith.constant 0 : index
    %c0_16 = arith.constant 0 : index
    %29 = vector.load %arg1[%c5, %c0_15, %c0_16] : memref<7x8x128xf32, #tpu.memory_space<vmem>>, vector<1x8x128xf32>
    %30 = vector.shape_cast %29 : vector<1x8x128xf32> to vector<8x128xf32>
    %c5_17 = arith.constant 5 : index
    %31 = memref.load %arg2[%c5_17] : memref<7xf32, #tpu.memory_space<smem>>
    %32 = vector.broadcast %31 : f32 to vector<8x128xf32>
    %33 = arith.mulf %30, %32 : vector<8x128xf32>
    %34 = arith.addf %28, %33 : vector<8x128xf32>
    %c6 = arith.constant 6 : index
    %c0_18 = arith.constant 0 : index
    %c0_19 = arith.constant 0 : index
    %35 = vector.load %arg1[%c6, %c0_18, %c0_19] : memref<7x8x128xf32, #tpu.memory_space<vmem>>, vector<1x8x128xf32>
    %36 = vector.shape_cast %35 : vector<1x8x128xf32> to vector<8x128xf32>
    %c6_20 = arith.constant 6 : index
    %37 = memref.load %arg2[%c6_20] : memref<7xf32, #tpu.memory_space<smem>>
    %38 = vector.broadcast %37 : f32 to vector<8x128xf32>
    %39 = arith.mulf %36, %38 : vector<8x128xf32>
    %40 = arith.addf %34, %39 : vector<8x128xf32>
    %c0_21 = arith.constant 0 : index
    %41 = memref.load %arg3[%c0_21] : memref<1xf32, #tpu.memory_space<smem>>
    %42 = vector.broadcast %41 : f32 to vector<8x128xf32>
    %43 = arith.addf %40, %42 : vector<8x128xf32>
    %44 = arith.negf %43 : vector<8x128xf32>
    %45 = math.exp %44 : vector<8x128xf32>
    %cst = arith.constant 1.000000e+00 : f32
    %46 = vector.broadcast %cst : f32 to vector<8x128xf32>
    %47 = arith.addf %46, %45 : vector<8x128xf32>
    %48 = arith.divf %46, %47 : vector<8x128xf32>
    %c0_22 = arith.constant 0 : index
    %c0_23 = arith.constant 0 : index
    %49 = vector.load %arg4[%c0_22, %c0_23] : memref<8x128xf32, #tpu.memory_space<vmem>>, vector<8x128xf32>
    tpu.vector_store %arg4[%c0_22, %c0_23], %48 {strides = array<i32>} : memref<8x128xf32, #tpu.memory_space<vmem>>, vector<8x128xf32>,
    return
  }
  func.func @transform_0(%arg0: i32) -> (i32, i32, i32) {
    %c0_i32 = arith.constant 0 : i32
    %c0_i32_0 = arith.constant 0 : i32
    %c0_i32_1 = arith.constant 0 : i32
    return %c0_i32, %arg0, %c0_i32_0 : i32, i32, i32
  }
  func.func @transform_1(%arg0: i32) -> i32 {
    %c0_i32 = arith.constant 0 : i32
    %c0_i32_0 = arith.constant 0 : i32
    return %c0_i32 : i32
  }
  func.func @transform_2(%arg0: i32) -> i32 {
    %c0_i32 = arith.constant 0 : i32
    %c0_i32_0 = arith.constant 0 : i32
    return %c0_i32 : i32
  }
  func.func @transform_3(%arg0: i32) -> (i32, i32) {
    %c0_i32 = arith.constant 0 : i32
    %c0_i32_0 = arith.constant 0 : i32
    return %arg0, %c0_i32 : i32, i32
  }
}

</mosaic_0001>

<bundles_post_ra>
// kernel: tpu_custom_call.1
= control target key start
LH: loop header
LB: loop body
LE: loop exit
PB: predicated region body
PF: predicated region fallthrough
CT: control target
= control target key end

     0   :  { %9 = vsyncpa [#allocation4], 0  ;;  %s220_s0 = inlined_call_operand.hbm [shape: f32[7,8,128], index: 0, kind: input, shape index: {}]   ;;  %s221_s1 = inlined_call_operand.vmem [shape: f32[7], index: 1, kind: input, shape index: {}]   ;;  %s222_s2 = inlined_call_operand.<no memory space> [shape: f32[1], index: 2, kind: input, shape index: {}]   ;;  %s223_s3 = inlined_call_operand.hbm [shape: f32[8,128], index: 3, kind: output, shape index: {}]  }
   0x1   :  { %10 = vsyncpa [#allocation6], 0 }
   0x2   :  { %11 = vsyncpa [#allocation5], 0  ;;  %s183_s12 = smov [#allocation3]   ;;  %s30_s16 = sshll.u32 %s221_s1, 4  ;;  %s31_s16 = int_to_ptr.vmem [resolvable:$true] %s30_s16 }
   0x3   :  { %s17_s13 = sshll.u32 %s183_s12, 4  ;;  %s18_s13 = int_to_ptr.vmem [resolvable:$true] %s17_s13 }
   0x4   :  { %s133_s17 = scalar_lea.vmem %s18_s13, 896  ;;  %p138_p1 = scmp.lt.s32.totalorder %s18_s13, %s18_s13 }
   0x5   :  { %p134_p0 = scmp.ne.s32.totalorder %s18_s13, %s133_s17  ;;  %p139_p2 = scmp.lt.s32.totalorder %s133_s17, %s133_s17 }
   0x7   :  { %p140_p3 = por %p139_p2, %p138_p1 }
   0x9   :  { %p141_p4 = pnand %p140_p3, %p134_p0 }
   0xb   :  { %144 = shalt.err (!%p141_p4)
}
   0xc   :  { %s184_s18 = smov 128   ;;  %s185_s19 = smov 8  }
   0xd   :  { %23 = dma.hbm_to_vmem [thread:$0]  %s220_s0, 896, %s18_s13, [#allocation4], %s184_s18, %s184_s18, %s185_s19  }
   0xe   :  { %s145_s22 = scalar_lea.vmem %s31_s16, 16  ;;  %p150_p6 = scmp.lt.s32.totalorder %s31_s16, %s31_s16 }
   0xf   :  { %p146_p5 = scmp.ne.s32.totalorder %s31_s16, %s145_s22  ;;  %p151_p7 = scmp.lt.s32.totalorder %s145_s22, %s145_s22 }
  0x11   :  { %p152_p8 = por %p151_p7, %p150_p6 }
  0x13   :  { %p153_p9 = pnand %p152_p8, %p146_p5 }
  0x15   :  { %156 = shalt.err (!%p153_p9)
}
  0x16   :  { %s186_s1 = smov [#allocation7]  }
  0x17   :  { %33 = dma.vmem_to_smem %s31_s16, 16, %s186_s1, [#allocation6]  }
  0x18   :  { %177 = dma.done.wait [#allocation4], 896  }
  0x19   :  { %178 = vsyncadd [#allocation4], 4294966400 }
  0x1a   :  { %179 = dma.done.wait [#allocation6], 16  }
  0x1b   :  { %180 = vsyncadd [#allocation6], 4294967280 }
  0x1c   :  { %42 = sfence }
  0x1d   :  { %s44_s23 = sld [smem:[#allocation7]]  ;;  %v43_v0 = vld [vmem:[#allocation3] sm:$0xff]  ;;  %v48_v1 = vld [vmem:[#allocation3 + $0x8] sm:$0xff]  ;;  %v54_v3 = vld [vmem:[#allocation3 + $0x10] sm:$0xff]  ;;  %v84_v26 = vstv %s222_s2  ;;  %s187_s4 = smov [#allocation8]  }
  0x1e   :  { %s109_s24 = sld [smem:[#allocation7 + $0x1]]  ;;  %v60_v6 = vld [vmem:[#allocation3 + $0x18] sm:$0xff]  ;;  %v66_v11 = vld [vmem:[#allocation3 + $0x20] sm:$0xff]  ;;  %v72_v15 = vld [vmem:[#allocation3 + $0x28] sm:$0xff]  ;;  %s99_s5 = sshll.u32 %s187_s4, 4  ;;  %s100_s5 = int_to_ptr.vmem [resolvable:$true] %s99_s5 }
  0x1f   :  { %s110_s25 = sld [smem:[#allocation7 + $0x2]]  ;;  %v78_v19 = vld [vmem:[#allocation3 + $0x30] sm:$0xff]  ;;  %s157_s6 = scalar_lea.vmem %s100_s5, 128 }
  0x20   :  { %s111_s26 = sld [smem:[#allocation7 + $0x3]]  ;;  %p158_p10 = scmp.ne.s32.totalorder %s100_s5, %s157_s6 }
  0x21   :  { %s112_s0 = sld [smem:[#allocation7 + $0x4]]  ;;  %p162_p11 = scmp.lt.s32.totalorder %s100_s5, %s100_s5 }
  0x22   :  { %s113_s27 = sld [smem:[#allocation7 + $0x5]]  ;;  %p163_p12 = scmp.lt.s32.totalorder %s157_s6, %s157_s6 }
  0x23   :  { %v45_v2 = vstv %s44_s23  ;;  %s114_s28 = sld [smem:[#allocation7 + $0x6]] }
  0x24   :  { %v46_v4 = vmul.f32 %v45_v2, %v43_v0  ;;  %v50_v5 = vstv %s109_s24  ;;  %p164_p13 = por %p163_p12, %p162_p11 }
  0x25   :  { %v51_v7 = vmul.f32 %v50_v5, %v48_v1  ;;  %v56_v8 = vstv %s110_s25 }
  0x26   :  { %v57_v9 = vmul.f32 %v56_v8, %v54_v3  ;;  %v62_v10 = vstv %s111_s26  ;;  %p165_p0 = pnand %p164_p13, %p158_p10 }
  0x27   :  { %v52_v12 = vadd.f32 %v51_v7, %v46_v4  ;;  %v63_v13 = vmul.f32 %v62_v10, %v60_v6  ;;  %v68_v14 = vstv %s112_s0 }
  0x28   :  { %v74_v16 = vstv %s113_s27  ;;  %v69_v18 = vmul.f32 %v68_v14, %v66_v11 }
  0x29   :  { %v58_v17 = vadd.f32 %v57_v9, %v52_v12  ;;  %v80_v20 = vstv %s114_s28  ;;  %v75_v22 = vmul.f32 %v74_v16, %v72_v15 }
  0x2a   :  { %v81_v24 = vmul.f32 %v80_v20, %v78_v19 }
  0x2b   :  { %v64_v21 = vadd.f32 %v63_v13, %v58_v17 }
  0x2d   :  { %v70_v23 = vadd.f32 %v69_v18, %v64_v21 }
  0x2f   :  { %v76_v25 = vadd.f32 %v75_v22, %v70_v23 }
  0x31   :  { %v82_v27 = vadd.f32 %v81_v24, %v76_v25 }
  0x33   :  { %v85_v28 = vadd.f32 %v84_v26, %v82_v27 }
  0x35   :  { %v115_v29 = vmul.f32 -1.442695, %v85_v28 }
  0x37   :  { %121 = vpow2.f32 %v115_v29 }
  0x44   :  { %v122_v30 = vpop.eup %121 }
  0x45   :  { %v89_v31 = vadd.f32 1.0, %v122_v30 }
  0x47   :  { %123 = vrcp.f32 %v89_v31 }
  0x54   :  { %v124_v32 = vpop.eup %123 }
  0x55   :  { %92 = vst [vmem:[#allocation8] sm:$0xff] %v124_v32 }
  0x56   :  { %168 = shalt.err (!%p165_p0)
}
  0x57   :  { %102 = dma.vmem_to_hbm [thread:$0]  %s100_s5, 128, %s223_s3, [#allocation5]  }
  0x58   :  { %181 = dma.done.wait [#allocation5], 128  }
  0x59   :  { %182 = vsyncadd [#allocation5], 4294967168 }
  0x5a   :  { %106 = vsyncpa [#allocation4], 1 }
  0x5b   :  { %107 = vsyncpa [#allocation5], 1 }
  0x5c   :  { %108 = vsyncpa [#allocation6], 1 }

</bundles_post_ra>
